<compile_context>
chip_gen: v6e
topology: v6e:2x2x1
jax: 0.10.0
libtpu: 0.0.40
codegen_flags: <defaults>
</compile_context>

<pallas_src>
import math
import functools

import jax
import jax.numpy as jnp
from jax import lax
from jax.experimental import pallas as pl
from jax.experimental.pallas import tpu as pltpu


# ----------------------------- Kernel 1: fused Q/K/V projections --------------------------------

def proj_kernel(q_ref, k_ref, v_ref,
                wq_ref, bq_ref, wk_ref, bk_ref, wv_ref, bv_ref,
                qo_ref, ko_ref, vo_ref):
    """One (batch, seq-tile) step: three wide MXU matmuls, fp32 accumulation, bf16 outputs."""
    qo_ref[0] = (jnp.dot(q_ref[0], wq_ref[...], preferred_element_type=jnp.float32)
                 + bq_ref[...]).astype(qo_ref.dtype)
    ko_ref[0] = (jnp.dot(k_ref[0], wk_ref[...], preferred_element_type=jnp.float32)
                 + bk_ref[...]).astype(ko_ref.dtype)
    vo_ref[0] = (jnp.dot(v_ref[0], wv_ref[...], preferred_element_type=jnp.float32)
                 + bv_ref[...]).astype(vo_ref.dtype)


# ----------------------------- Kernel 2: flash attention + residual add + LayerNorm --------------

def flash_attn_norm_kernel(q_ref, k_ref, v_ref, res_ref, scale_ref, shift_ref,
                           o_ref, m_scr, l_scr, acc_scr,
                           *, num_heads, d_k, d_v, eps):
    """One (batch, q-tile, kv-tile) step with online softmax.

    q_ref:   (1, tq, H*d_k) bf16       k_ref: (1, tk, H*d_k) bf16      v_ref: (1, tk, H*d_v) bf16
    res_ref: (1, tq, E) bf16           scale/shift: (1, E) fp32
    o_ref:   (1, tq, E)                scratch: m/l (H, tq, 1) fp32, acc (tq, E) fp32
    """
    kv = pl.program_id(2)

    @pl.when(kv == 0)
    def _init():
        m_scr[...] = jnp.full(m_scr.shape, -jnp.inf, dtype=m_scr.dtype)
        l_scr[...] = jnp.zeros(l_scr.shape, dtype=l_scr.dtype)
        acc_scr[...] = jnp.zeros(acc_scr.shape, dtype=acc_scr.dtype)

    q_all = q_ref[0]                                   # (tq, H*d_k) bf16, 1/sqrt(d_k) pre-folded
    k_all = k_ref[0]                                   # (tk, H*d_k) bf16
    v_all = v_ref[0]                                   # (tk, H*d_v) bf16

    # Static Python loop over heads (H is small); intermediates are consumed into VMEM scratch
    # each iteration, so no head-concat and no growing list of live (tq, tk) tiles.
    for h in range(num_heads):
        q_h = q_all[:, h * d_k:(h + 1) * d_k]          # (tq, d_k)
        k_h = k_all[:, h * d_k:(h + 1) * d_k]          # (tk, d_k)
        v_h = v_all[:, h * d_v:(h + 1) * d_v]          # (tk, d_v)

        # Contract last dims of both operands -> no explicit (tk, d_k)->(d_k, tk) transpose (XLU).
        s = lax.dot_general(q_h, k_h, (((1,), (1,)), ((), ())),
                            preferred_element_type=jnp.float32)        # (tq, tk) fp32

        m_prev = m_scr[h]                                              # (tq, 1)
        m_new = jnp.maximum(m_prev, jnp.max(s, axis=-1, keepdims=True))
        alpha = jnp.exp(m_prev - m_new)                                # (tq, 1)
        p = jnp.exp(s - m_new)                                         # (tq, tk) fp32

        l_scr[h] = alpha * l_scr[h] + jnp.sum(p, axis=-1, keepdims=True)
        sl = slice(h * d_v, (h + 1) * d_v)
        # Deferred softmax normalization: accumulate the un-normalized PV product.
        acc_scr[:, sl] = alpha * acc_scr[:, sl] + jnp.dot(
            p.astype(v_h.dtype), v_h, preferred_element_type=jnp.float32)
        m_scr[h] = m_new

    @pl.when(kv == pl.num_programs(2) - 1)
    def _finalize():
        # One O(tq*d_v) reciprocal-multiply per head instead of scaling the (tq, tk) prob tile.
        for h in range(num_heads):
            sl = slice(h * d_v, (h + 1) * d_v)
            acc_scr[:, sl] = acc_scr[:, sl] * pl.reciprocal(l_scr[h], approx=True)

        # Fused residual add + module LayerNorm:  scale * (x - mean) / (std_unbiased + eps + shift)
        x = acc_scr[...] + res_ref[0].astype(jnp.float32)              # (tq, E) fp32
        feat = x.shape[-1]
        mean = jnp.mean(x, axis=-1, keepdims=True)
        diff = x - mean
        var = jnp.sum(diff * diff, axis=-1, keepdims=True) * (1.0 / (feat - 1))  # torch.std unbiased
        std = jnp.sqrt(var)                                            # (tq, 1)
        div = std + eps + shift_ref[...]                               # (tq,1)+(1,E) -> (tq,E)
        inv_div = pl.reciprocal(div, approx=False)                     # exact: LayerNorm precision
        o_ref[0] = (scale_ref[...] * diff * inv_div).astype(o_ref.dtype)


# ----------------------------- Wrapper ------------------------------------------------------------

def multi_head_attention(query, key, value, residual_x, params, *, eps=1e-6,
                         tq=None, tk=None, out_dtype=jnp.float32,
                         vmem_limit_bytes=64 * 1024 * 1024):
    """params: dict with per-head wq,bq,wk,bk,wv,bv and LayerNorm scale, shift."""
    B, S, E = query.shape
    H, _, d_k = params["wq"].shape
    d_v = params["wv"].shape[-1]
    assert H * d_v == E, "embed_dim must equal num_heads * d_v (concat dim)"
    Hdk, Hdv = H * d_k, H * d_v

    # Tile heuristic (toy shapes use the full S).  v6e (128 MiB VMEM): 512-row tiles reach ~85% of
    # HBM roofline; v7x (64 MiB VMEM) / v5e prefer 256.  bf16 blocks want multiples of 16 sublanes.
    if tq is None:
        tq = S if S <= 512 else 512
    if tk is None:
        tk = S if S <= 512 else 512
    tp = tq                              # projection seq tile
    for t in (tq, tk, tp):
        assert S % t == 0 and (t == S or t % 16 == 0)
    n_qt, n_kt, n_pt = S // tq, S // tk, S // tp

    bf16 = jnp.bfloat16
    inv_sqrt_dk = 1.0 / math.sqrt(d_k)
    # Stack per-head weights into wide lane-dense matrices; head h owns columns [h*d : (h+1)*d].
    # Fold 1/sqrt(d_k) into Wq / bq here (free: wrapper is already rewriting/casting weights).
    wq_all = (jnp.transpose(params["wq"], (1, 0, 2)).reshape(E, Hdk) * inv_sqrt_dk).astype(bf16)
    bq_all = (params["bq"].reshape(1, Hdk) * inv_sqrt_dk).astype(jnp.float32)
    wk_all = jnp.transpose(params["wk"], (1, 0, 2)).reshape(E, Hdk).astype(bf16)
    bk_all = params["bk"].reshape(1, Hdk).astype(jnp.float32)
    wv_all = jnp.transpose(params["wv"], (1, 0, 2)).reshape(E, Hdv).astype(bf16)
    bv_all = params["bv"].reshape(1, Hdv).astype(jnp.float32)
    scale2 = params["scale"].reshape(1, E).astype(jnp.float32)
    shift2 = params["shift"].reshape(1, E).astype(jnp.float32)

    # Activations stream as bf16 (half the DMA bytes); fp32 math stays inside the kernels.
    q_bf = query.astype(bf16)
    k_bf = key.astype(bf16)
    v_bf = value.astype(bf16)
    res_bf = residual_x.astype(bf16)

    cparams = pltpu.CompilerParams(
        dimension_semantics=("parallel", "parallel"),
        vmem_limit_bytes=vmem_limit_bytes)

    # -------- Kernel 1: project Q, K, V once per token (no per-q-tile recompute of K/V) ----------
    seq_spec = pl.BlockSpec((1, tp, E), lambda b, t: (b, t, 0))
    wdk_spec = pl.BlockSpec((E, Hdk), lambda b, t: (0, 0), pipeline_mode=pl.Buffered(1))
    wdv_spec = pl.BlockSpec((E, Hdv), lambda b, t: (0, 0), pipeline_mode=pl.Buffered(1))
    bdk_spec = pl.BlockSpec((1, Hdk), lambda b, t: (0, 0), pipeline_mode=pl.Buffered(1))
    bdv_spec = pl.BlockSpec((1, Hdv), lambda b, t: (0, 0), pipeline_mode=pl.Buffered(1))

    q_proj, k_proj, v_proj = pl.pallas_call(
        proj_kernel,
        out_shape=(jax.ShapeDtypeStruct((B, S, Hdk), bf16),
                   jax.ShapeDtypeStruct((B, S, Hdk), bf16),
                   jax.ShapeDtypeStruct((B, S, Hdv), bf16)),
        grid_spec=pltpu.PrefetchScalarGridSpec(
            num_scalar_prefetch=0,
            grid=(B, n_pt),
            in_specs=[seq_spec, seq_spec, seq_spec,
                      wdk_spec, bdk_spec,      # wq, bq (scale pre-folded)
                      wdk_spec, bdk_spec,      # wk, bk
                      wdv_spec, bdv_spec],     # wv, bv
            out_specs=[pl.BlockSpec((1, tp, Hdk), lambda b, t: (b, t, 0)),
                       pl.BlockSpec((1, tp, Hdk), lambda b, t: (b, t, 0)),
                       pl.BlockSpec((1, tp, Hdv), lambda b, t: (b, t, 0))]),
        compiler_params=cparams,
    )(q_bf, k_bf, v_bf, wq_all, bq_all, wk_all, bk_all, wv_all, bv_all)

    # -------- Kernel 2: flash attention (KV-tiled, online softmax) + add & LayerNorm -------------
    # Note for v7x megacore: B * n_qt parallel steps (>= 2 here) keep both TensorCores busy.
    q_spec = pl.BlockSpec((1, tq, Hdk), lambda b, qi, ki: (b, qi, 0))
    k_spec = pl.BlockSpec((1, tk, Hdk), lambda b, qi, ki: (b, ki, 0))
    v_spec = pl.BlockSpec((1, tk, Hdv), lambda b, qi, ki: (b, ki, 0))
    res_spec = pl.BlockSpec((1, tq, E), lambda b, qi, ki: (b, qi, 0))
    vec_spec = pl.BlockSpec((1, E), lambda b, qi, ki: (0, 0), pipeline_mode=pl.Buffered(1))
    out_spec = pl.BlockSpec((1, tq, E), lambda b, qi, ki: (b, qi, 0))

    return pl.pallas_call(
        functools.partial(flash_attn_norm_kernel, num_heads=H, d_k=d_k, d_v=d_v, eps=eps),
        out_shape=jax.ShapeDtypeStruct((B, S, E), out_dtype),
        grid_spec=pltpu.PrefetchScalarGridSpec(
            num_scalar_prefetch=0,
            grid=(B, n_qt, n_kt),
            in_specs=[q_spec, k_spec, v_spec, res_spec, vec_spec, vec_spec],
            out_specs=out_spec,
            scratch_shapes=[pltpu.VMEM((H, tq, 1), jnp.float32),   # running max  m
                            pltpu.VMEM((H, tq, 1), jnp.float32),   # running sum  l
                            pltpu.VMEM((tq, E), jnp.float32)]),    # per-head output slab
        compiler_params=pltpu.CompilerParams(
            dimension_semantics=("parallel", "parallel", "arbitrary"),
            vmem_limit_bytes=vmem_limit_bytes),
    )(q_proj, k_proj, v_proj, res_bf, scale2, shift2)


# ----------------------------- Pure-JAX fp32 reference (module-faithful) --------------------------

def reference(query, key, value, residual_x, params, d_k, eps=1e-6):
    H = params["wq"].shape[0]
    outs = []
    for h in range(H):
        q = query @ params["wq"][h] + params["bq"][h, 0]
        k = key @ params["wk"][h] + params["bk"][h, 0]
        v = value @ params["wv"][h] + params["bv"][h, 0]
        s = (q @ jnp.swapaxes(k, 1, 2)) / math.sqrt(d_k)
        p = jax.nn.softmax(s, axis=-1)
        outs.append(p @ v)
    x = jnp.concatenate(outs, axis=2) + residual_x
    mean = x.mean(-1, keepdims=True)
    std = jnp.sqrt(jnp.sum((x - mean) ** 2, axis=-1, keepdims=True) / (x.shape[-1] - 1))
    div = std + eps + params["shift"]
    return params["scale"] * (x - mean) / div


# ----------------------------- Main ---------------------------------------------------------------

if __name__ == "__main__":
    # Small shapes consistent with the module: embed_dim = num_heads * d_v
    B, S = 2, 8
    embed_dim = 32
    num_heads = 4
    d_k = 8
    d_v = embed_dim // num_heads   # 8

    key0 = jax.random.PRNGKey(0)
    ks = jax.random.split(key0, 12)

    params = {
        "wq": jax.random.normal(ks[0], (num_heads, embed_dim, d_k), jnp.float32) * 0.1,
        "bq": jax.random.normal(ks[1], (num_heads, 1, d_k), jnp.float32) * 0.1,
        "wk": jax.random.normal(ks[2], (num_heads, embed_dim, d_k), jnp.float32) * 0.1,
        "bk": jax.random.normal(ks[3], (num_heads, 1, d_k), jnp.float32) * 0.1,
        "wv": jax.random.normal(ks[4], (num_heads, embed_dim, d_v), jnp.float32) * 0.1,
        "bv": jax.random.normal(ks[5], (num_heads, 1, d_v), jnp.float32) * 0.1,
        "scale": jnp.ones((embed_dim,), jnp.float32),
        "shift": jnp.zeros((embed_dim,), jnp.float32),
    }

    query = jax.random.normal(ks[6], (B, S, embed_dim), jnp.float32)
    key_in = jax.random.normal(ks[7], (B, S, embed_dim), jnp.float32)
    value = jax.random.normal(ks[8], (B, S, embed_dim), jnp.float32)
    residual_x = jax.random.normal(ks[9], (B, S, embed_dim), jnp.float32)

    out = multi_head_attention(query, key_in, value, residual_x, params)
    out = jax.block_until_ready(out)

    ref = reference(query, key_in, value, residual_x, params, d_k)
    assert out.shape == (B, S, embed_dim)
    # Kernel streams bf16 activations and uses bf16 MXU operands (fp32 accumulation / softmax /
    # LayerNorm); tolerance covers bf16 input + operand rounding vs the fp32 reference.
    assert jnp.allclose(out, ref, atol=3e-2, rtol=3e-2), "mismatch vs reference"

    print("KERNEL_OK")
</pallas_src>

<mosaic_0001>
module attributes {stable_mosaic.version = 11 : i64} {
  func.func @proj_kernel(%arg0: i32, %arg1: i32, %arg2: memref<1x8x32xbf16, #tpu.memory_space<vmem>>, %arg3: memref<1x8x32xbf16, #tpu.memory_space<vmem>>, %arg4: memref<1x8x32xbf16, #tpu.memory_space<vmem>>, %arg5: memref<32x32xbf16, #tpu.memory_space<vmem>>, %arg6: memref<1x32xf32, #tpu.memory_space<vmem>>, %arg7: memref<32x32xbf16, #tpu.memory_space<vmem>>, %arg8: memref<1x32xf32, #tpu.memory_space<vmem>>, %arg9: memref<32x32xbf16, #tpu.memory_space<vmem>>, %arg10: memref<1x32xf32, #tpu.memory_space<vmem>>, %arg11: memref<1x8x32xbf16, #tpu.memory_space<vmem>>, %arg12: memref<1x8x32xbf16, #tpu.memory_space<vmem>>, %arg13: memref<1x8x32xbf16, #tpu.memory_space<vmem>>) attributes {dimension_semantics = [#tpu.dimension_semantics<parallel>, #tpu.dimension_semantics<parallel>], iteration_bounds = array<i64: 2, 1>, scalar_prefetch = 0 : i64, scratch_operands = 0 : i64, tpu.core_type = #tpu.core_type<tc>, window_params = [{transform_indices = @transform_0, window_bounds = array<i64: 1, 8, 32>}, {transform_indices = @transform_1, window_bounds = array<i64: 1, 8, 32>}, {transform_indices = @transform_2, window_bounds = array<i64: 1, 8, 32>}, {pipeline_mode = #tpu.pipeline_mode<synchronous>, transform_indices = @transform_3, window_bounds = array<i64: 32, 32>}, {pipeline_mode = #tpu.pipeline_mode<synchronous>, transform_indices = @transform_4, window_bounds = array<i64: 1, 32>}, {pipeline_mode = #tpu.pipeline_mode<synchronous>, transform_indices = @transform_5, window_bounds = array<i64: 32, 32>}, {pipeline_mode = #tpu.pipeline_mode<synchronous>, transform_indices = @transform_6, window_bounds = array<i64: 1, 32>}, {pipeline_mode = #tpu.pipeline_mode<synchronous>, transform_indices = @transform_7, window_bounds = array<i64: 32, 32>}, {pipeline_mode = #tpu.pipeline_mode<synchronous>, transform_indices = @transform_8, window_bounds = array<i64: 1, 32>}, {transform_indices = @transform_9, window_bounds = array<i64: 1, 8, 32>}, {transform_indices = @transform_10, window_bounds = array<i64: 1, 8, 32>}, {transform_indices = @transform_11, window_bounds = array<i64: 1, 8, 32>}]} {
    %c0 = arith.constant 0 : index
    %c0_0 = arith.constant 0 : index
    %c0_1 = arith.constant 0 : index
    %0 = vector.load %arg2[%c0, %c0_0, %c0_1] : memref<1x8x32xbf16, #tpu.memory_space<vmem>>, vector<1x8x32xbf16>
    %1 = vector.shape_cast %0 : vector<1x8x32xbf16> to vector<8x32xbf16>
    %c0_2 = arith.constant 0 : index
    %c0_3 = arith.constant 0 : index
    %2 = vector.load %arg5[%c0_2, %c0_3] : memref<32x32xbf16, #tpu.memory_space<vmem>>, vector<32x32xbf16>
    %cst = arith.constant dense<0.000000e+00> : vector<8x32xf32>
    %3 = tpu.matmul %1, %2, %cst {dimension_numbers = #tpu.dot_dimension_numbers<[1], [0], [0], [1], [0, 0, 1, 1], [], []>} : vector<8x32xbf16>, vector<32x32xbf16>, vector<8x32xf32> -> vector<8x32xf32>
    %c0_4 = arith.constant 0 : index
    %c0_5 = arith.constant 0 : index
    %4 = vector.load %arg6[%c0_4, %c0_5] : memref<1x32xf32, #tpu.memory_space<vmem>>, vector<1x32xf32>
    %5 = vector.broadcast %4 : vector<1x32xf32> to vector<8x32xf32>
    %6 = arith.addf %3, %5 : vector<8x32xf32>
    %7 = arith.truncf %6 : vector<8x32xf32> to vector<8x32xbf16>
    %c0_6 = arith.constant 0 : index
    %c0_7 = arith.constant 0 : index
    %c0_8 = arith.constant 0 : index
    %8 = vector.load %arg11[%c0_6, %c0_7, %c0_8] : memref<1x8x32xbf16, #tpu.memory_space<vmem>>, vector<1x8x32xbf16>
    %9 = vector.shape_cast %8 : vector<1x8x32xbf16> to vector<8x32xbf16>
    %10 = vector.shape_cast %7 : vector<8x32xbf16> to vector<1x8x32xbf16>
    tpu.vector_store %arg11[%c0_6, %c0_7, %c0_8], %10 {strides = array<i32>} : memref<1x8x32xbf16, #tpu.memory_space<vmem>>, vector<1x8x32xbf16>,
    %c0_9 = arith.constant 0 : index
    %c0_10 = arith.constant 0 : index
    %c0_11 = arith.constant 0 : index
    %11 = vector.load %arg3[%c0_9, %c0_10, %c0_11] : memref<1x8x32xbf16, #tpu.memory_space<vmem>>, vector<1x8x32xbf16>
    %12 = vector.shape_cast %11 : vector<1x8x32xbf16> to vector<8x32xbf16>
    %c0_12 = arith.constant 0 : index
    %c0_13 = arith.constant 0 : index
    %13 = vector.load %arg7[%c0_12, %c0_13] : memref<32x32xbf16, #tpu.memory_space<vmem>>, vector<32x32xbf16>
    %cst_14 = arith.constant dense<0.000000e+00> : vector<8x32xf32>
    %14 = tpu.matmul %12, %13, %cst_14 {dimension_numbers = #tpu.dot_dimension_numbers<[1], [0], [0], [1], [0, 0, 1, 1], [], []>} : vector<8x32xbf16>, vector<32x32xbf16>, vector<8x32xf32> -> vector<8x32xf32>
    %c0_15 = arith.constant 0 : index
    %c0_16 = arith.constant 0 : index
    %15 = vector.load %arg8[%c0_15, %c0_16] : memref<1x32xf32, #tpu.memory_space<vmem>>, vector<1x32xf32>
    %16 = vector.broadcast %15 : vector<1x32xf32> to vector<8x32xf32>
    %17 = arith.addf %14, %16 : vector<8x32xf32>
    %18 = arith.truncf %17 : vector<8x32xf32> to vector<8x32xbf16>
    %c0_17 = arith.constant 0 : index
    %c0_18 = arith.constant 0 : index
    %c0_19 = arith.constant 0 : index
    %19 = vector.load %arg12[%c0_17, %c0_18, %c0_19] : memref<1x8x32xbf16, #tpu.memory_space<vmem>>, vector<1x8x32xbf16>
    %20 = vector.shape_cast %19 : vector<1x8x32xbf16> to vector<8x32xbf16>
    %21 = vector.shape_cast %18 : vector<8x32xbf16> to vector<1x8x32xbf16>
    tpu.vector_store %arg12[%c0_17, %c0_18, %c0_19], %21 {strides = array<i32>} : memref<1x8x32xbf16, #tpu.memory_space<vmem>>, vector<1x8x32xbf16>,
    %c0_20 = arith.constant 0 : index
    %c0_21 = arith.constant 0 : index
    %c0_22 = arith.constant 0 : index
    %22 = vector.load %arg4[%c0_20, %c0_21, %c0_22] : memref<1x8x32xbf16, #tpu.memory_space<vmem>>, vector<1x8x32xbf16>
    %23 = vector.shape_cast %22 : vector<1x8x32xbf16> to vector<8x32xbf16>
    %c0_23 = arith.constant 0 : index
    %c0_24 = arith.constant 0 : index
    %24 = vector.load %arg9[%c0_23, %c0_24] : memref<32x32xbf16, #tpu.memory_space<vmem>>, vector<32x32xbf16>
    %cst_25 = arith.constant dense<0.000000e+00> : vector<8x32xf32>
    %25 = tpu.matmul %23, %24, %cst_25 {dimension_numbers = #tpu.dot_dimension_numbers<[1], [0], [0], [1], [0, 0, 1, 1], [], []>} : vector<8x32xbf16>, vector<32x32xbf16>, vector<8x32xf32> -> vector<8x32xf32>
    %c0_26 = arith.constant 0 : index
    %c0_27 = arith.constant 0 : index
    %26 = vector.load %arg10[%c0_26, %c0_27] : memref<1x32xf32, #tpu.memory_space<vmem>>, vector<1x32xf32>
    %27 = vector.broadcast %26 : vector<1x32xf32> to vector<8x32xf32>
    %28 = arith.addf %25, %27 : vector<8x32xf32>
    %29 = arith.truncf %28 : vector<8x32xf32> to vector<8x32xbf16>
    %c0_28 = arith.constant 0 : index
    %c0_29 = arith.constant 0 : index
    %c0_30 = arith.constant 0 : index
    %30 = vector.load %arg13[%c0_28, %c0_29, %c0_30] : memref<1x8x32xbf16, #tpu.memory_space<vmem>>, vector<1x8x32xbf16>
    %31 = vector.shape_cast %30 : vector<1x8x32xbf16> to vector<8x32xbf16>
    %32 = vector.shape_cast %29 : vector<8x32xbf16> to vector<1x8x32xbf16>
    tpu.vector_store %arg13[%c0_28, %c0_29, %c0_30], %32 {strides = array<i32>} : memref<1x8x32xbf16, #tpu.memory_space<vmem>>, vector<1x8x32xbf16>,
    return
  }
  func.func @transform_0(%arg0: i32, %arg1: i32) -> (i32, i32, i32) {
    %c0_i32 = arith.constant 0 : i32
    %c0_i32_0 = arith.constant 0 : i32
    return %arg0, %arg1, %c0_i32 : i32, i32, i32
  }
  func.func @transform_1(%arg0: i32, %arg1: i32) -> (i32, i32, i32) {
    %c0_i32 = arith.constant 0 : i32
    %c0_i32_0 = arith.constant 0 : i32
    return %arg0, %arg1, %c0_i32 : i32, i32, i32
  }
  func.func @transform_2(%arg0: i32, %arg1: i32) -> (i32, i32, i32) {
    %c0_i32 = arith.constant 0 : i32
    %c0_i32_0 = arith.constant 0 : i32
    return %arg0, %arg1, %c0_i32 : i32, i32, i32
  }
  func.func @transform_3(%arg0: i32, %arg1: i32) -> (i32, i32) {
    %c0_i32 = arith.constant 0 : i32
    %c0_i32_0 = arith.constant 0 : i32
    %c0_i32_1 = arith.constant 0 : i32
    return %c0_i32, %c0_i32_0 : i32, i32
  }
  func.func @transform_4(%arg0: i32, %arg1: i32) -> (i32, i32) {
    %c0_i32 = arith.constant 0 : i32
    %c0_i32_0 = arith.constant 0 : i32
    %c0_i32_1 = arith.constant 0 : i32
    return %c0_i32, %c0_i32_0 : i32, i32
  }
  func.func @transform_5(%arg0: i32, %arg1: i32) -> (i32, i32) {
    %c0_i32 = arith.constant 0 : i32
    %c0_i32_0 = arith.constant 0 : i32
    %c0_i32_1 = arith.constant 0 : i32
    return %c0_i32, %c0_i32_0 : i32, i32
  }
  func.func @transform_6(%arg0: i32, %arg1: i32) -> (i32, i32) {
    %c0_i32 = arith.constant 0 : i32
    %c0_i32_0 = arith.constant 0 : i32
    %c0_i32_1 = arith.constant 0 : i32
    return %c0_i32, %c0_i32_0 : i32, i32
  }
  func.func @transform_7(%arg0: i32, %arg1: i32) -> (i32, i32) {
    %c0_i32 = arith.constant 0 : i32
    %c0_i32_0 = arith.constant 0 : i32
    %c0_i32_1 = arith.constant 0 : i32
    return %c0_i32, %c0_i32_0 : i32, i32
  }
  func.func @transform_8(%arg0: i32, %arg1: i32) -> (i32, i32) {
    %c0_i32 = arith.constant 0 : i32
    %c0_i32_0 = arith.constant 0 : i32
    %c0_i32_1 = arith.constant 0 : i32
    return %c0_i32, %c0_i32_0 : i32, i32
  }
  func.func @transform_9(%arg0: i32, %arg1: i32) -> (i32, i32, i32) {
    %c0_i32 = arith.constant 0 : i32
    %c0_i32_0 = arith.constant 0 : i32
    return %arg0, %arg1, %c0_i32 : i32, i32, i32
  }
  func.func @transform_10(%arg0: i32, %arg1: i32) -> (i32, i32, i32) {
    %c0_i32 = arith.constant 0 : i32
    %c0_i32_0 = arith.constant 0 : i32
    return %arg0, %arg1, %c0_i32 : i32, i32, i32
  }
  func.func @transform_11(%arg0: i32, %arg1: i32) -> (i32, i32, i32) {
    %c0_i32 = arith.constant 0 : i32
    %c0_i32_0 = arith.constant 0 : i32
    return %arg0, %arg1, %c0_i32 : i32, i32, i32
  }
}

</mosaic_0001>

<bundles_post_ra>
// kernel: tpu_custom_call.1
= control target key start
LH: loop header
LB: loop body
LE: loop exit
PB: predicated region body
PF: predicated region fallthrough
CT: control target
= control target key end

     0   :  { %s1960_s0 = inlined_call_operand.hbm [shape: bf16[2,8,32], index: 0, kind: input, shape index: {}]   ;;  %s1961_s1 = inlined_call_operand.hbm [shape: bf16[2,8,32], index: 1, kind: input, shape index: {}]   ;;  %s1962_s2 = inlined_call_operand.hbm [shape: bf16[2,8,32], index: 2, kind: input, shape index: {}]   ;;  %s1963_s3 = inlined_call_operand.hbm [shape: bf16[32,32], index: 3, kind: input, shape index: {}]   ;;  %s1964_s4 = inlined_call_operand.vmem [shape: f32[1,32], index: 4, kind: input, shape index: {}]   ;;  %s1965_s5 = inlined_call_operand.hbm [shape: bf16[32,32], index: 5, kind: input, shape index: {}]   ;;  %s1966_s6 = inlined_call_operand.vmem [shape: f32[1,32], index: 6, kind: input, shape index: {}]   ;;  %s1967_s7 = inlined_call_operand.hbm [shape: bf16[32,32], index: 7, kind: input, shape index: {}]   ;;  %s1968_s8 = inlined_call_operand.vmem [shape: f32[1,32], index: 8, kind: input, shape index: {}]   ;;  %s1969_s9 = inlined_call_operand.hbm [shape: bf16[2,8,32], index: 9, kind: output, shape index: {0}]   ;;  %s1970_s10 = inlined_call_operand.hbm [shape: bf16[2,8,32], index: 10, kind: output, shape index: {1}]   ;;  %s1971_s11 = inlined_call_operand.hbm [shape: bf16[2,8,32], index: 11, kind: output, shape index: {2}]  }
   0x1   :  { %1992 = sst [smem:[#allocation29_spill]] %s1961_s1 }
   0x2   :  { %1993 = sst [smem:[#allocation30_spill]] %s1963_s3 }
   0x3   :  { %1994 = sst [smem:[#allocation31_spill]] %s1965_s5 }
   0x4   :  { %1995 = sst [smem:[#allocation32_spill]] %s1968_s8 }
   0x5   :  { %1996 = sst [smem:[#allocation33_spill]] %s1970_s10 }
   0x6   :  { %1997 = sst [smem:[#allocation34_spill]] %s1971_s11 }
   0x7   :  { %17 = vsyncpa [#allocation3], 0 }
   0x8   :  { %19 = vsyncpa [#allocation3 + $0x1], 0 }
   0x9   :  { %20 = vsyncpa [#allocation6], 0 }
   0xa   :  { %22 = vsyncpa [#allocation6 + $0x1], 0 }
   0xb   :  { %23 = vsyncpa [#allocation9], 0 }
   0xc   :  { %24 = vsyncpa [#allocation12], 0 }
   0xd   :  { %25 = vsyncpa [#allocation4], 0 }
   0xe   :  { %27 = vsyncpa [#allocation4 + $0x1], 0 }
   0xf   :  { %28 = vsyncpa [#allocation15], 0 }
  0x10   :  { %30 = vsyncpa [#allocation15 + $0x1], 0  ;;  %s1626_s17 = smov 0   ;;  %s1628_s18 = smov 0  }
  0x11   :  { %s1630_s19 = smov 0   ;;  %s1632_s20 = smov 0  }
  0x12   :  { %s1634_s21 = smov 0   ;;  %s1636_s22 = smov 0  }
  0x13 LB: > { %1998 = sst [smem:[#allocation23_spill]] %s1531_s17  ;;  %s1657_s23 = sadd.s32 4294967295, %s1551_s22   ;;  %s1551_s22 = sphi %s1636_s22, %s36_s22   ;;  %s1547_s21 = sphi %s1634_s21, %s2041_s21   ;;  %s1543_s20 = sphi %s1632_s20, %s2040_s20   ;;  %s1539_s19 = sphi %s1630_s19, %s2044_s19   ;;  %s1535_s18 = sphi %s1628_s18, %s2043_s18   ;;  %s1531_s17 = sphi %s1626_s17, %s2042_s17  }
  0x14   : > { %1999 = sst [smem:[#allocation24_spill]] %s1547_s21  ;;  %s1972_s24 = sadd.s32 4294967294, %s1551_s22  }
  0x15   : > { %2000 = sst [smem:[#allocation25_spill]] %s1551_s22  ;;  %p70_p0 = scmp.ne.s32.totalorder %s1535_s18, %s1531_s17 }
  0x16   : > { %p1986_p1 = scmp.eq.s32.totalorder %s1657_s23, 0  ;;  %p284_p3 = scmp.eq.s32.totalorder %s1972_s24, 1 }
  0x17   : > { %p1044_p5 = scmp.ge.s32.totalorder %s1551_s22, 1  ;;  %p347_p7 = scmp.lt.s32.totalorder %s1551_s22, 3 }
  0x18   : > { %p1668_p4 = por %p1986_p1, %p70_p0  ;;  %p1673_p6 = por %p284_p3, %p70_p0 }
  0x19   : > { %p1678_p8 = pnand %p1044_p5, %p347_p7  ;;  %s1553_s28 = smov [#allocation8]  }
  0x1a   : > { %s2001_s25 = scalar_select %p1668_p4, 1, 0 }
  0x1b   : > { %s2002_s26 = scalar_select %p1673_p6, 1, 0 }
  0x1c   : > { %s2004_s27 = scalar_select %p1678_p8, 1, 0 }
  0x1d   : > { %2003 = sst [smem:[#allocation26_spill]] %s2002_s26  ;;  %s359_s29 = sshll.u32 %s1553_s28, 4  ;;  %s360_s29 = int_to_ptr.vmem [resolvable:$true] %s359_s29 }
  0x1e   : > { %p1142_p9 = pneg %p1678_p8  ;;  %s48_s12 = sadd.s32 1, %s1547_s21 }
  0x1f   : > { %s1252_s13 = scalar_lea.vmem %s360_s29, 256  ;;  %p1260_p5 = scmp.lt.s32.totalorder %s360_s29, %s360_s29 }
  0x20   : > { %p1687_p11 = pnand %p1142_p9, %p1986_p1  ;;  %p1253_p13 = scmp.ne.s32.totalorder %s360_s29, %s1252_s13 }
  0x21   : > { %p1261_p7 = scmp.lt.s32.totalorder %s1252_s13, %s1252_s13 }
  0x22   : > { %p1987_p12 = pneg %p1687_p11 }
  0x23   : > { %p1262_p2 = por %p1261_p7, %p1260_p5 }
  0x24   : > { %p1255_p0 = pnand %p1253_p13, %p1987_p12 }
  0x26   : > { %p1256_p3 = pneg %p1255_p0 }
  0x28   : > { %p1263_p10 = pnand %p1262_p2, %p1256_p3 }
  0x2a   : > { %1266 = shalt.err (!%p1263_p10)
}
  0x2b   : > { %s1975_s14 = smov 64   ;;  %s1977_s15 = smov 4  }
  0x2c   : > { %s2006_s3 = sld [smem:[#allocation30_spill]]  ;;  %p50_p2 = scmp.ge.s32.totalorder %s48_s12, 2 }
  0x2d   : > { %s57_s13 = sadd.s32 1, %s1539_s19  ;;  %p64_p9 = scmp.ne.s32.totalorder %s1539_s19, %s1535_s18 }
  0x2e   : > { %p65_p10 = scmp.eq.s32.totalorder %s1551_s22, 0  ;;  %s2046_s12 = smov (%p50_p2, %s48_s12), 0 }
  0x2f   : > { %2007 = sst [smem:[#allocation27_spill]] %s2046_s12  ;;  %p2008_p0 = scmp.eq.s32.totalorder %s1657_s23, 1 }
  0x30   : > { %p66_p13 = por %p65_p10, %p64_p9  ;;  %s52_s26 = ssub.s32 %s1547_s21, %s2046_s12 }
  0x31   : > { %p1713_p3 = por %p2008_p0, %p64_p9  ;;  %p1175_p5 = scmp.lt.s32.totalorder %s1551_s22, 2 }
  0x32   : > { %1145 = dma.hbm_to_vmem [thread:$0]  (!%p1687_p11), %s2006_s3, 256, %s360_s29, [#allocation9], %s1975_s14, %s1975_s14, %s1977_s15  }
  0x33   : > { %s2009_s24 = scalar_select %p1713_p3, 1, 0 }
  0x34   : > { %p55_p7 = scmp.eq.s32.totalorder %s52_s26, 0  ;;  %s1981_s17 = sand.u32 1, %s1539_s19  }
  0x35   : > { %s1723_s29 = sshll.u32 %s1981_s17, 2  ;;  %s1726_s16 = sshll.u32 %s1547_s21, 6 }
  0x36   : > { %s1729_s28 = scalar_select %p55_p7, %s1539_s19, %s57_s13  }
  0x37   : > { %p1731_p2 = pnand %p1175_p5, %p66_p13  ;;  %s427_s15 = sand.u32 1, %s1551_s22  }
  0x38   : > { %2010 = sst [smem:[#allocation28_spill]] %s1729_s28  ;;  %s431_s11 = scalar_lea.vmem [#allocation5], %s1723_s29 }
  0x39   : > { %s2012_s1 = sld [smem:[#allocation29_spill]]  ;;  %s439_s17 = sshll.u32 %s431_s11, 4  ;;  %s440_s17 = int_to_ptr.vmem [resolvable:$true] %s439_s17 }
  0x3a   : > { %s1556_s8 = smov [#allocation10]   ;;  %s1741_s10 = scalar_lea.sflag [#allocation6], %s427_s15 }
  0x3b   : > { %s375_s21 = sshll.u32 %s1556_s8, 4  ;;  %p1988_p9 = pneg %p1731_p2  ;;  %s376_s21 = int_to_ptr.vmem [resolvable:$true] %s375_s21 }
  0x3c   : > { %s1280_s13 = scalar_lea.vmem %s440_s17, 64  ;;  %s1557_s28 = smov [#allocation5]  }
  0x3d   : > { %p1281_p10 = scmp.ne.s32.totalorder %s440_s17, %s1280_s13  ;;  %s1285_s22 = sshll.u32 %s1557_s28, 4  ;;  %s1286_s22 = int_to_ptr.vmem [resolvable:$false] %s1285_s22 }
  0x3e   : > { %s1287_s3 = scalar_lea.vmem %s1286_s22, 128  ;;  %p1288_p5 = scmp.lt.s32.totalorder %s440_s17, %s1286_s22 }
  0x3f   : > { %s437_s26 = scalar_lea.hbm %s2012_s1, %s1726_s16  ;;  %p1283_p13 = pnand %p1281_p10, %p1988_p9 }
  0x40   : > { %p1289_p7 = scmp.lt.s32.totalorder %s1287_s3, %s1280_s13 }
  0x41   : > { %p1284_p0 = pneg %p1283_p13 }
  0x42   : > { %p1290_p1 = por %p1289_p7, %p1288_p5 }
  0x44   : > { %p1291_p12 = pnand %p1290_p1, %p1284_p0 }
  0x46   : > { %1294 = shalt.err (!%p1291_p12)
}
  0x47   : > { %1158 = dma.hbm_to_vmem [thread:$0]  (!%p1731_p2), %s437_s26, 64, %s440_s17, %s1741_s10  }
  0x48   : > { %s1306_s8 = scalar_lea.vmem %s376_s21, 256  ;;  %p2013_p10 = pneg %p1687_p11 }
  0x49   : > { %p1307_p6 = scmp.ne.s32.totalorder %s376_s21, %s1306_s8  ;;  %p1314_p3 = scmp.lt.s32.totalorder %s376_s21, %s376_s21 }
  0x4a   : > { %p1315_p4 = scmp.lt.s32.totalorder %s1306_s8, %s1306_s8 }
  0x4b   : > { %p1309_p13 = pnand %p1307_p6, %p2013_p10 }
  0x4c   : > { %p1316_p8 = por %p1315_p4, %p1314_p3 }
  0x4d   : > { %p1310_p9 = pneg %p1309_p13 }
  0x4f   : > { %p1317_p5 = pnand %p1316_p8, %p1310_p9 }
  0x51   : > { %1320 = shalt.err (!%p1317_p5)
}
  0x52   : > { %s2014_s11 = smov 4   ;;  %s2015_s22 = smov 64  }
  0x53   : > { %s2016_s5 = sld [smem:[#allocation31_spill]]  ;;  %s1558_s17 = smov [#allocation11]  }
  0x54   : > { %s391_s28 = sshll.u32 %s1558_s17, 4  ;;  %p2017_p6 = pmov %p2013_p10  ;;  %s392_s28 = int_to_ptr.vmem [resolvable:$true] %s391_s28 }
  0x55   : > { %s1332_s26 = scalar_lea.vmem %s392_s28, 256  ;;  %p1340_p12 = scmp.lt.s32.totalorder %s392_s28, %s392_s28 }
  0x56   : > { %p1333_p1 = scmp.ne.s32.totalorder %s392_s28, %s1332_s26  ;;  %p1341_p3 = scmp.lt.s32.totalorder %s1332_s26, %s1332_s26 }
  0x58   : > { %p1335_p4 = pnand %p1333_p1, %p2017_p6  ;;  %p1342_p9 = por %p1341_p3, %p1340_p12 }
  0x59   : > { %1148 = dma.hbm_to_vmem [thread:$0]  (!%p1687_p11), %s2016_s5, 256, %s376_s21, [#allocation9], %s2015_s22, %s2015_s22, %s2014_s11  }
  0x5a   : > { %p1336_p8 = pneg %p1335_p4 }
  0x5c   : > { %p1343_p0 = pnand %p1342_p9, %p1336_p8 }
  0x5e   : > { %1346 = shalt.err (!%p1343_p0)
}
  0x5f   : > { %1151 = dma.hbm_to_vmem [thread:$0]  (!%p1687_p11), %s1967_s7, 256, %s392_s28, [#allocation12], %s2015_s22, %s2015_s22, %s2014_s11  }
  0x60   : > { %s418_s12 = scalar_lea.hbm %s1960_s0, %s1726_s16  ;;  %s412_s15 = scalar_lea.vmem [#allocation2], %s1723_s29 }
  0x61   : > { %s420_s17 = sshll.u32 %s412_s15, 4  ;;  %s2018_s26 = sand.u32 1, %s1539_s19   ;;  %s421_s17 = int_to_ptr.vmem [resolvable:$true] %s420_s17 }
  0x62   : > { %s409_s30 = scalar_lea.sflag [#allocation3], %s2018_s26  ;;  %s1360_s1 = scalar_lea.vmem %s421_s17, 64 }
  0x63   : > { %p1361_p7 = scmp.ne.s32.totalorder %s421_s17, %s1360_s1  ;;  %p2019_p10 = pneg %p1731_p2 }
  0x64   : > { %s1559_s21 = smov [#allocation2]  }
  0x65   : > { %p1363_p13 = pnand %p1361_p7, %p2019_p10  ;;  %s1365_s13 = sshll.u32 %s1559_s21, 4  ;;  %s1366_s13 = int_to_ptr.vmem [resolvable:$false] %s1365_s13 }
  0x66   : > { %s1367_s5 = scalar_lea.vmem %s1366_s13, 128  ;;  %p1368_p11 = scmp.lt.s32.totalorder %s421_s17, %s1366_s13 }
  0x67   : > { %p1364_p5 = pneg %p1363_p13  ;;  %p1369_p1 = scmp.lt.s32.totalorder %s1367_s5, %s1360_s1 }
  0x69   : > { %p1370_p6 = por %p1369_p1, %p1368_p11 }
  0x6b   : > { %p1371_p4 = pnand %p1370_p6, %p1364_p5 }
  0x6d   : > { %1374 = shalt.err (!%p1371_p4)
}
  0x6e   : > { %1155 = dma.hbm_to_vmem [thread:$0]  (!%p1731_p2), %s418_s12, 64, %s421_s17, %s409_s30  }
  0x6f   : > { %s456_s28 = scalar_lea.hbm %s1962_s2, %s1726_s16  ;;  %s450_s3 = scalar_lea.vmem [#allocation7], %s1723_s29 }
  0x70   : > { %s458_s8 = sshll.u32 %s450_s3, 4  ;;  %p2020_p12 = pmov %p2019_p10  ;;  %s459_s8 = int_to_ptr.vmem [resolvable:$true] %s458_s8 }
  0x71   : > { %s1388_s15 = scalar_lea.vmem %s459_s8, 64  ;;  %s1560_s1 = smov [#allocation7]  }
  0x72   : > { %p1389_p8 = scmp.ne.s32.totalorder %s459_s8, %s1388_s15  ;;  %s1393_s5 = sshll.u32 %s1560_s1, 4  ;;  %s1394_s5 = int_to_ptr.vmem [resolvable:$false] %s1393_s5 }
  0x73   : > { %s1395_s26 = scalar_lea.vmem %s1394_s5, 128  ;;  %p1396_p0 = scmp.lt.s32.totalorder %s459_s8, %s1394_s5 }
  0x74   : > { %p1391_p3 = pnand %p1389_p8, %p2020_p12  ;;  %p1397_p7 = scmp.lt.s32.totalorder %s1395_s26, %s1388_s15 }
  0x76   : > { %p1392_p9 = pneg %p1391_p3  ;;  %p1398_p10 = por %p1397_p7, %p1396_p0 }
  0x78   : > { %p1399_p13 = pnand %p1398_p10, %p1392_p9 }
  0x7a   : > { %1402 = shalt.err (!%p1399_p13)
}
  0x7b   : > { %1161 = dma.hbm_to_vmem [thread:$0]  (!%p1731_p2), %s456_s28, 64, %s459_s8, %s1741_s10  }
  0x7c   : > { %p2021_p5 = scmp.ne.s32.totalorder %s2004_s27, 0 }
  0x7d   : > { %s1799_s29 = sand.u32 (!%p2021_p5), 1, %s1535_s18   ;;  %p2022_p11 = scmp.ne.s32.totalorder (!%p2021_p5), %s2001_s25, 0 }
  0x7e   : > { %467 = sbr.rel (%p2021_p5) target bundleno = 408 (0x198), region = 56  ;;  %s1802_s16 = sshll.u32 (!%p2021_p5), %s1799_s29, 2 }
  0x7f   : > { %s470_s12 = scalar_lea.sflag (!%p2021_p5), [#allocation3], %s1799_s29  ;;  %s473_s17 = scalar_lea.vmem (!%p2021_p5), [#allocation2], %s1802_s16 }
  0x83   : > { %1506 = dma.done.wait (%p2022_p11), %s470_s12, 64  }
  0x84   : > { %1508 = vsyncadd (%p2022_p11), %s470_s12, 4294967232  ;;  %s478_s10 = sand.u32 1, %s1657_s23   ;;  %s482_s14 = scalar_lea.vmem [#allocation5], %s1802_s16 }
  0x85   : > { %s479_s27 = scalar_lea.sflag [#allocation6], %s478_s10 }
  0x86   : > { %1510 = dma.done.wait (%p2022_p11), %s479_s27, 128  }
  0x87   : > { %1512 = vsyncadd (%p2022_p11), %s479_s27, 4294967168  ;;  %s491_s30 = scalar_lea.vmem [#allocation7], %s1802_s16  ;;  %p2023_p2 = scmp.eq.s32.totalorder %s1657_s23, 0 }
  0x89   : > { %1514 = dma.done.wait (%p2023_p2), [#allocation9], 512   ;;  %p2024_p1 = pmov %p2023_p2 }
  0x8b   : > { %1516 = vsyncadd (%p2024_p1), [#allocation9], 4294966784  ;;  %p2025_p6 = pmov %p2024_p1 }
  0x8c   : > { %p2026_p4 = pmov %p2024_p1 }
  0x8d   : > { %1518 = dma.done.wait (%p2025_p6), [#allocation12], 256  }
  0x8e   : > { %1520 = vsyncadd (%p2026_p4), [#allocation12], 4294967040  ;;  %v1561_v0 = vmov 0.0   ;;  %vm1562_vm0 = vmmov 0   ;;  %v1235_v1 = vld [vmem:[#allocation8 + $0x8] sm:$0xff]   ;;  %v1236_v2 = vld [vmem:[#allocation10 + $0x8] sm:$0xff]  }
  0x8f   : > { %1094 = vmatprep.subr.bf16.mxu0 %v1561_v0  ;;  %1102 = vmatprep.subr.bf16.mxu1 %v1561_v0  ;;  %v1237_v3 = vld [vmem:[#allocation8] sm:$0xff]   ;;  %v1238_v4 = vld [vmem:[#allocation10] sm:$0xff]   ;;  %v563_v5 = vld [vmem:[%s473_s17] sm:$0xf]  ;;  %vm587_vm1 = vcmask 261120   ;;  %s1839_s22 = sshll.u32 %s1543_s20, 6 }
  0x90   : > { %1098 = vmatprep.mubr.msk.bf16.mxu0 %vm1562_vm0, %v1561_v0  ;;  %1106 = vmatprep.mubr.msk.bf16.mxu1 %vm1562_vm0, %v1561_v0  ;;  %v1239_v6 = vld [vmem:[#allocation11 + $0x8] sm:$0xff]   ;;  %v634_v7 = vld [vmem:[%s482_s14] sm:$0xf]  ;;  %v1240_v8 = vld [vmem:[#allocation11] sm:$0xff]   ;;  %s547_s28 = scalar_lea.vmem [#allocation13], %s1802_s16  ;;  %s554_s8 = scalar_lea.vmem [#allocation14], %s1802_s16 }
  0x91   : > { %1095 = vmatpush3.bf16.msra.mxu0 %v1235_v1  ;;  %1103 = vmatpush3.bf16.msra.mxu1 %v1236_v2  ;;  %v703_v9 = vld [vmem:[%s491_s30] sm:$0xf]  ;;  %v1065_v10 = vld [vmem:[%s1964_s4] ss:$0 sm:$0xff]  ;;  %s797_s3 = sshll.u32 %s547_s28, 4  ;;  %s811_s15 = sshll.u32 %s554_s8, 4  ;;  %s1849_s3 = int_to_ptr.vmem [resolvable:$true] %s797_s3  ;;  %s1857_s15 = int_to_ptr.vmem [resolvable:$true] %s811_s15 }
  0x92   : > { %1096 = vmatprep.subr.bf16.mxu0 %v1561_v0  ;;  %1104 = vmatprep.subr.bf16.mxu1 %v1561_v0  ;;  %v1069_v11 = vld [vmem:[%s1966_s6] ss:$0 sm:$0xff]  ;;  %vm632_vm2 = vcmask 257024   ;;  %s1847_s20 = scalar_lea.hbm %s1969_s9, %s1839_s22  ;;  %s2027_s17 = sld [smem:[#allocation33_spill]] }
  0x93   : > { %s2029_s21 = sld [smem:[#allocation32_spill]]  ;;  %s773_s13 = scalar_lea.sflag [#allocation4], %s1799_s29 }
  0x94   : > { %s1403_s11 = scalar_lea.vmem %s1849_s3, 64  ;;  %p2030_p12 = scmp.ne.s32.totalorder %s2009_s24, 0 }
  0x95   : > { %1097 = vmatpush3.bf16.msra.mxu0 %v1237_v3  ;;  %1105 = vmatpush3.bf16.msra.mxu1 %v1238_v4  ;;  %p1404_p8 = scmp.ne.s32.totalorder %s1849_s3, %s1403_s11  ;;  %s1563_s1 = smov [#allocation13]  }
  0x96   : > { %1110 = vmatprep.subr.bf16.mxu0 %v1561_v0  ;;  %s1407_s5 = sshll.u32 %s1563_s1, 4  ;;  %s1408_s5 = int_to_ptr.vmem [resolvable:$false] %s1407_s5 }
  0x97   : > { %p1405_p3 = pnand %p1404_p8, %p2030_p12  ;;  %s1409_s26 = scalar_lea.vmem %s1408_s5, 128 }
  0x98   : > { %1099 = vmatmul.mubr.msk.bf16.vlgmr.msra.gmra.mxu0 %vm587_vm1, %v563_v5  ;;  %1107 = vmatmul.mubr.msk.bf16.vlgmr.msra.gmra.mxu1 %vm587_vm1, %v634_v7  ;;  %s2028_s27 = smov %s2027_s17  ;;  %s1855_s14 = scalar_lea.hbm %s2027_s17, %s1839_s22 }
  0x99   : > { %1111 = vmatpush3.bf16.msra.mxu0 %v1239_v6  ;;  %1114 = vmatprep.mubr.msk.bf16.mxu0 %vm1562_vm0, %v1561_v0  ;;  %v1073_v23 = vld [vmem:[%s2029_s21] ss:$0 sm:$0xff]  ;;  %p1406_p9 = pneg %p1405_p3  ;;  %p1410_p0 = scmp.lt.s32.totalorder %s1849_s3, %s1408_s5 }
  0x9a   : > { %1112 = vmatprep.subr.bf16.mxu0 %v1561_v0  ;;  %p1411_p7 = scmp.lt.s32.totalorder %s1409_s26, %s1403_s11 }
  0x9c   : > { %p1412_p10 = por %p1411_p7, %p1410_p0 }
  0x9d   : > { %1113 = vmatpush3.bf16.msra.mxu0 %v1240_v8 }
  0x9e   : > { %p1413_p13 = pnand %p1412_p10, %p1406_p9 }
  0xa0   : > { %1115 = vmatmul.mubr.msk.bf16.vlgmr.msra.gmra.mxu0 %vm587_vm1, %v703_v9 }
 0x158   : > { %v625_v12 = vpop.f32.mrf.mxu0  ;;  %v695_v14 = vpop.f32.mrf.mxu1 }
 0x159   : > { %v626_v13 = vadd.f32 %v1065_v10, %v625_v12  ;;  %v696_v16 = vadd.f32 %v1069_v11, %v695_v14 }
 0x15a   : > { %v1100_v15 = vpop.f32.mrf.mxu0  ;;  %v1108_v18 = vpop.f32.mrf.mxu1 }
 0x15b   : > { %v631_v17 = vpack.c.bf16 %v626_v13, %v626_v13  ;;  %v701_v19 = vpack.c.bf16 %v696_v16, %v696_v16 }
 0x15c   : > { %v628_v20 = vpop.f32.mrf.mxu0  ;;  %v698_v21 = vpop.f32.mrf.mxu1 }
 0x15d   : > { %633 = vst.msk [vmem:[%s547_s28] sm:$0xf] %vm632_vm2, %v631_v17  ;;  %702 = vst.msk [vmem:[%s554_s8] sm:$0xf] %vm632_vm2, %v701_v19 }
 0x15e   : > { %v1101_v22 = vpop.f32.mrf.mxu0 }
 0x15f   : > { %1416 = shalt.err (!%p1413_p13)
}
 0x160   : > { %s1417_s28 = scalar_lea.hbm %s1847_s20, 64  ;;  %s1421_s12 = scalar_lea.hbm %s1969_s9, 128 }
 0x161   : > { %p1418_p5 = scmp.ne.s32.totalorder %s1847_s20, %s1417_s28  ;;  %p1422_p1 = scmp.lt.s32.totalorder %s1847_s20, %s1969_s9 }
 0x162   : > { %p1423_p6 = scmp.lt.s32.totalorder %s1421_s12, %s1417_s28 }
 0x163   : > { %p1419_p11 = pnand %p1418_p5, %p2030_p12 }
 0x164   : > { %p1424_p4 = por %p1423_p6, %p1422_p1 }
 0x165   : > { %p1420_p2 = pneg %p1419_p11 }
 0x167   : > { %p1425_p8 = pnand %p1424_p4, %p1420_p2 }
 0x169   : > { %1428 = shalt.err (!%p1425_p8)
}
 0x16a   : > { %1136 = dma.vmem_to_hbm [thread:$0]  (%p2030_p12), %s1849_s3, 64, %s1847_s20, %s773_s13   ;;  %v1109_v24 = vpop.f32.mrf.mxu1 }
 0x16b   : > { %s1887_s25 = scalar_lea.sflag [#allocation15], %s478_s10  ;;  %s1429_s21 = scalar_lea.vmem %s1857_s15, 64 }
 0x16c   : > { %p1430_p3 = scmp.ne.s32.totalorder %s1857_s15, %s1429_s21  ;;  %s1564_s11 = smov [#allocation14]  }
 0x16d   : > { %s1433_s1 = sshll.u32 %s1564_s11, 4  ;;  %s1434_s1 = int_to_ptr.vmem [resolvable:$false] %s1433_s1 }
 0x16e   : > { %p1431_p9 = pnand %p1430_p3, %p2030_p12  ;;  %s1435_s5 = scalar_lea.vmem %s1434_s1, 128 }
 0x16f   : > { %p1436_p7 = scmp.lt.s32.totalorder %s1857_s15, %s1434_s1  ;;  %p1437_p10 = scmp.lt.s32.totalorder %s1435_s5, %s1429_s21 }
 0x170   : > { %p1432_p0 = pneg %p1431_p9 }
 0x171   : > { %p1438_p13 = por %p1437_p10, %p1436_p7 }
 0x173   : > { %p1439_p5 = pnand %p1438_p13, %p1432_p0 }
 0x175   : > { %1442 = shalt.err (!%p1439_p5)
}
 0x176   : > { %s1443_s23 = scalar_lea.hbm %s1855_s14, 64  ;;  %s1447_s20 = scalar_lea.hbm %s2028_s27, 128 }
 0x177   : > { %p1444_p11 = scmp.ne.s32.totalorder %s1855_s14, %s1443_s23  ;;  %p1448_p6 = scmp.lt.s32.totalorder %s1855_s14, %s2028_s27 }
 0x178   : > { %p1449_p4 = scmp.lt.s32.totalorder %s1447_s20, %s1443_s23 }
 0x179   : > { %p1445_p2 = pnand %p1444_p11, %p2030_p12 }
 0x17a   : > { %p1450_p8 = por %p1449_p4, %p1448_p6 }
 0x17b   : > { %p1446_p1 = pneg %p1445_p2 }
 0x17d   : > { %p1451_p3 = pnand %p1450_p8, %p1446_p1 }
 0x17f   : > { %1454 = shalt.err (!%p1451_p3)
}
 0x180   : > { %1137 = dma.vmem_to_hbm [thread:$0]  (%p2030_p12), %s1857_s15, 64, %s1855_s14, %s1887_s25   ;;  %v764_v25 = vpop.f32.mrf.mxu0 }
 0x181   : > { %s561_s28 = scalar_lea.vmem [#allocation16], %s1802_s16  ;;  %v765_v26 = vadd.f32 %v1073_v23, %v764_v25  ;;  %s2031_s17 = sld [smem:[#allocation34_spill]] }
 0x182   : > { %s825_s29 = sshll.u32 %s561_s28, 4  ;;  %v1116_v27 = vpop.f32.mrf.mxu0  ;;  %s1565_s16 = smov [#allocation16]   ;;  %s826_s29 = int_to_ptr.vmem [resolvable:$true] %s825_s29 }
 0x183   : > { %v770_v28 = vpack.c.bf16 %v765_v26, %v765_v26  ;;  %s1455_s11 = scalar_lea.vmem %s826_s29, 64  ;;  %s1459_s15 = sshll.u32 %s1565_s16, 4  ;;  %s1460_s15 = int_to_ptr.vmem [resolvable:$false] %s1459_s15 }
 0x184   : > { %v767_v29 = vpop.f32.mrf.mxu0  ;;  %p1456_p9 = scmp.ne.s32.totalorder %s826_s29, %s1455_s11  ;;  %s1461_s14 = scalar_lea.vmem %s1460_s15, 128 }
 0x185   : > { %771 = vst.msk [vmem:[%s561_s28] sm:$0xf] %vm632_vm2, %v770_v28  ;;  %p1462_p10 = scmp.lt.s32.totalorder %s826_s29, %s1460_s15  ;;  %p1463_p13 = scmp.lt.s32.totalorder %s1461_s14, %s1455_s11 }
 0x186   : > { %v1117_v30 = vpop.f32.mrf.mxu0  ;;  %p1457_p0 = pnand %p1456_p9, %p2030_p12 }
 0x187   : > { %s2032_s30 = smov %s2031_s17  ;;  %s1915_s21 = scalar_lea.hbm %s2031_s17, %s1839_s22 }
 0x188   : > { %p1458_p7 = pneg %p1457_p0  ;;  %p1464_p5 = por %p1463_p13, %p1462_p10 }
 0x18a   : > { %p1465_p11 = pnand %p1464_p5, %p1458_p7 }
 0x18c   : > { %1468 = shalt.err (!%p1465_p11)
}
 0x18d   : > { %s1469_s22 = scalar_lea.hbm %s1915_s21, 64  ;;  %s1473_s23 = scalar_lea.hbm %s2032_s30, 128 }
 0x18e   : > { %p1470_p2 = scmp.ne.s32.totalorder %s1915_s21, %s1469_s22  ;;  %p1474_p4 = scmp.lt.s32.totalorder %s1915_s21, %s2032_s30 }
 0x18f   : > { %p1475_p8 = scmp.lt.s32.totalorder %s1473_s23, %s1469_s22 }
 0x190   : > { %p1471_p1 = pnand %p1470_p2, %p2030_p12 }
 0x191   : > { %p1476_p3 = por %p1475_p8, %p1474_p4 }
 0x192   : > { %p1472_p6 = pneg %p1471_p1 }
 0x194   : > { %p1477_p9 = pnand %p1476_p3, %p1472_p6 }
 0x196   : > { %1480 = shalt.err (!%p1477_p9)
}
 0x197   : > { %1138 = dma.vmem_to_hbm [thread:$0]  (%p2030_p12), %s826_s29, 64, %s1915_s21, %s1887_s25  }
 0x198 PF: > { %s2033_s20 = sld [smem:[#allocation23_spill]] }
 0x199   : > { %s2034_s13 = sld [smem:[#allocation26_spill]] }
 0x19a   : > { %s2035_s26 = sld [smem:[#allocation25_spill]] }
 0x19e   : > { %s837_s28 = sand.u32 1, %s2033_s20  }
 0x19f   : > { %p2036_p0 = scmp.ne.s32.totalorder %s2034_s13, 0  ;;  %s838_s8 = scalar_lea.sflag [#allocation4], %s837_s28 }
 0x1a0   : > { %p2037_p7 = scmp.ge.s32.totalorder %s2035_s26, 2 }
 0x1a2   : > { %p1163_p10 = pnand %p2037_p7, %p2036_p0 }
 0x1a4   : > { %p1164_p13 = pneg %p1163_p10 }
 0x1a6   : > { %1522 = dma.done.wait (%p1164_p13), %s838_s8, 64  }
 0x1a7   : > { %1524 = vsyncadd (%p1164_p13), %s838_s8, 4294967232  ;;  %s2038_s12 = sadd.s32 4294967294, %s2035_s26  }
 0x1a8   : > { %s846_s17 = sand.u32 1, %s2038_s12  }
 0x1a9   : > { %s847_s11 = scalar_lea.sflag [#allocation15], %s846_s17 }
 0x1aa   : > { %1526 = dma.done.wait (%p1164_p13), %s847_s11, 128  }
 0x1ab   : > { %1528 = vsyncadd (%p1164_p13), %s847_s11, 4294967168  ;;  %s36_s22 = sadd.s32 1, %s2035_s26   ;;  %s2039_s24 = sld [smem:[#allocation28_spill]] }
 0x1ac   : > { %p33_p12 = scmp.ge.s32.totalorder %s36_s22, 4   ;;  %s2040_s20 = sld [smem:[#allocation24_spill]] }
 0x1ad   : > { %s2041_s21 = sld [smem:[#allocation27_spill]]  ;;  %s2042_s17 = smov %s1535_s18 }
 0x1ae   : > { %s2043_s18 = smov %s1539_s19  ;;  %35 = sbr.rel (!%p33_p12) target bundleno = 19 (0x13), region = 169 }
 0x1b1   : > { %s2044_s19 = smov %s2039_s24 }
 0x1b3   :  { %861 = vsyncpa [#allocation3], 1 }
 0x1b4   :  { %863 = vsyncpa [#allocation3 + $0x1], 1 }
 0x1b5   :  { %864 = vsyncpa [#allocation6], 1 }
 0x1b6   :  { %866 = vsyncpa [#allocation6 + $0x1], 1 }
 0x1b7   :  { %867 = vsyncpa [#allocation9], 1 }
 0x1b8   :  { %868 = vsyncpa [#allocation12], 1 }
 0x1b9   :  { %869 = vsyncpa [#allocation4], 1 }
 0x1ba   :  { %871 = vsyncpa [#allocation4 + $0x1], 1 }
 0x1bb   :  { %872 = vsyncpa [#allocation15], 1 }
 0x1bc   :  { %874 = vsyncpa [#allocation15 + $0x1], 1 }

</bundles_post_ra>
